<compile_context>
chip_gen: v7x
topology: tpu7x:2x2x1
jax: 0.10.0
libtpu: 0.0.40
codegen_flags: <defaults>
</compile_context>

<pallas_src>
import math

import numpy as np

import jax
import jax.numpy as jnp
from jax.experimental import pallas as pl
from jax.experimental.pallas import tpu as pltpu

FULL_BODY_NODE = list(range(21))  # [0, 1, ..., 20]
N_POOL = len(FULL_BODY_NODE)      # 21 -> avg_pool2d kernel_size=(21, 1)

_LANE = 128
_SUBLANE = 8


def _round_up(x, m):
    return -(-x // m) * m


def _round_down(x, m):
    return (x // m) * m


def _sublane_multiple(itemsize):
    # minimal legal second-to-last block dim: 8 (f32), 16 (bf16), 32 (int8)
    itemsize = int(itemsize)
    return (4 // itemsize) * _SUBLANE if itemsize <= 4 else _SUBLANE


def _padded_block_bytes(rows, cols, itemsize):
    sub = _sublane_multiple(itemsize)
    return _round_up(rows, sub) * _round_up(cols, _LANE) * int(itemsize)


def _choose_fold(bt, n_joint, n_channel, mat_cap_bytes):
    """Largest fold G (<= ideal lane-filling fold) dividing BT with a small matrix."""
    g_ideal = _LANE // math.gcd(n_channel, _LANE)
    g_ideal = max(1, min(g_ideal, bt))
    for g in range(g_ideal, 0, -1):
        if bt % g:
            continue
        mat_bytes = _padded_block_bytes(g * n_joint * n_channel, g * n_channel, 4)
        if mat_bytes <= mat_cap_bytes:
            return g
    return 1


def _choose_tile_rows(n_rows, padded_row_bytes, budget_bytes, row_multiple):
    t = max(1, budget_bytes // max(1, padded_row_bytes))
    t = max(row_multiple, _round_down(t, row_multiple))
    # keep at least two grid steps so v7x can shard the "parallel" axis over 2 TCs
    if n_rows >= 2 * row_multiple:
        half = _round_up(_round_up(n_rows, 2) // 2, row_multiple)
        t = min(t, half)
    return n_rows if t >= n_rows else t


def _joint_mean_kernel(x_ref, a_ref, o_ref):
    # x_ref: (tile, G*J*C), a_ref: (G*J*C, G*C) resident constant, o_ref: (tile, G*C)
    o_ref[...] = jnp.dot(
        x_ref[...].astype(jnp.float32),
        a_ref[...],
        preferred_element_type=jnp.float32,
    ).astype(o_ref.dtype)


def kit_init_s1_to_s4(s1_input, *,
                      input_block_budget_bytes=4 << 20,
                      mat_budget_bytes=2 << 20):
    """s1_input: (bs, n_frame, n_s1_joint, n_channel) -> (bs, n_frame, n_channel)."""
    bs, n_frame, n_joint, n_channel = s1_input.shape
    assert n_joint >= N_POOL
    dtype = s1_input.dtype
    itemsize = jnp.dtype(dtype).itemsize

    bt = bs * n_frame
    g = _choose_fold(bt, n_joint, n_channel, mat_budget_bytes)
    m = bt // g
    in_cols = g * n_joint * n_channel
    out_cols = g * n_channel

    # Contiguous reshape: no HBM data movement.
    x2d = s1_input.reshape(m, in_cols)

    # Constant block-diagonal averaging matrix: bakes the [:21] joint selection
    # and the 1/21 mean; nonzero entries A[gg*J*C + j*C + c, gg*C + c] = 1/21.
    a_np = np.zeros((g, n_joint, n_channel, g, n_channel), np.float32)
    eye_c = np.eye(n_channel, dtype=np.float32) / N_POOL
    for gg in range(g):
        a_np[gg, :N_POOL, :, gg, :] = eye_c
    avg_mat = jnp.asarray(a_np.reshape(in_cols, out_cols))

    row_multiple = max(16, _sublane_multiple(itemsize))
    padded_in_row_bytes = _round_up(in_cols, _LANE) * itemsize
    tile = _choose_tile_rows(m, padded_in_row_bytes,
                             input_block_budget_bytes, row_multiple)

    grid = (pl.cdiv(m, tile),)

    # Explicit scoped-VMEM budget from PADDED block bytes (2 bufs each).
    in_blk = _padded_block_bytes(tile, in_cols, itemsize)
    out_blk = _padded_block_bytes(tile, out_cols, itemsize)
    mat_blk = _padded_block_bytes(in_cols, out_cols, 4)
    vmem_need = 2 * (in_blk + out_blk + mat_blk)
    vmem_limit = int(min(max(vmem_need + (4 << 20), 16 << 20), 32 << 20))

    out2d = pl.pallas_call(
        _joint_mean_kernel,
        out_shape=jax.ShapeDtypeStruct((m, out_cols), dtype),
        grid=grid,
        in_specs=[
            # Last block dims equal the full array dims -> legal for any G, C, J.
            pl.BlockSpec((tile, in_cols), lambda i: (i, 0)),
            # Constant block index -> the averaging matrix is DMA'd once and
            # stays resident in VMEM across all grid steps.
            pl.BlockSpec((in_cols, out_cols), lambda i: (0, 0)),
        ],
        out_specs=pl.BlockSpec((tile, out_cols), lambda i: (i, 0)),
        compiler_params=pltpu.CompilerParams(
            dimension_semantics=("parallel",),
            vmem_limit_bytes=vmem_limit,
        ),
        cost_estimate=pl.CostEstimate(
            flops=2 * m * in_cols * out_cols,
            transcendentals=0,
            bytes_accessed=(bt * n_joint * n_channel + bt * n_channel) * itemsize
                           + in_cols * out_cols * 4,
        ),
    )(x2d, avg_mat)

    # view(bs, n_frame, -1): contiguous reshape, free.
    return out2d.reshape(bs, n_frame, n_channel)


if __name__ == "__main__":
    key = jax.random.PRNGKey(0)

    # Primary small shape consistent with the module (KIT skeleton: 21 joints).
    bs, n_frame, n_joint, n_channel = 2, 8, 21, 4
    x = jax.random.normal(key, (bs, n_frame, n_joint, n_channel), dtype=jnp.float32)
    y = jax.block_until_ready(kit_init_s1_to_s4(x))
    ref = jnp.mean(x[:, :, :N_POOL, :], axis=2)
    assert y.shape == (bs, n_frame, n_channel), y.shape
    assert jnp.allclose(y, ref, atol=1e-5, rtol=1e-5), "mismatch vs reference (toy)"

    # Second small check that exercises the fully lane-dense folded path (G=32).
    x2 = jax.random.normal(jax.random.PRNGKey(1), (2, 64, 21, 4), dtype=jnp.float32)
    y2 = jax.block_until_ready(kit_init_s1_to_s4(x2))
    ref2 = jnp.mean(x2[:, :, :N_POOL, :], axis=2)
    assert y2.shape == (2, 64, 4), y2.shape
    assert jnp.allclose(y2, ref2, atol=1e-5, rtol=1e-5), "mismatch vs reference (folded)"

    print("KERNEL_OK")
</pallas_src>

<mosaic_0001>
module attributes {stable_mosaic.version = 11 : i64} {
  func.func @_joint_mean_kernel(%arg0: i32, %arg1: memref<1x1344xf32, #tpu.memory_space<vmem>>, %arg2: memref<1344x64xf32, #tpu.memory_space<vmem>>, %arg3: memref<1x64xf32, #tpu.memory_space<vmem>>) attributes {dimension_semantics = [#tpu.dimension_semantics<parallel>], iteration_bounds = array<i64: 1>, scalar_prefetch = 0 : i64, scratch_operands = 0 : i64, tpu.core_type = #tpu.core_type<tc>, window_params = [{transform_indices = @transform_0, window_bounds = array<i64: 1, 1344>}, {pipeline_mode = #tpu.pipeline_mode<synchronous>, transform_indices = @transform_1, window_bounds = array<i64: 1344, 64>}, {transform_indices = @transform_2, window_bounds = array<i64: 1, 64>}]} {
    %c0 = arith.constant 0 : index
    %c0_0 = arith.constant 0 : index
    %0 = vector.load %arg1[%c0, %c0_0] : memref<1x1344xf32, #tpu.memory_space<vmem>>, vector<1x1344xf32>
    %c0_1 = arith.constant 0 : index
    %c0_2 = arith.constant 0 : index
    %1 = vector.load %arg2[%c0_1, %c0_2] : memref<1344x64xf32, #tpu.memory_space<vmem>>, vector<1344x64xf32>
    %cst = arith.constant dense<0.000000e+00> : vector<1x64xf32>
    %2 = tpu.matmul %0, %1, %cst {dimension_numbers = #tpu.dot_dimension_numbers<[1], [0], [0], [1], [0, 0, 1, 1], [], []>} : vector<1x1344xf32>, vector<1344x64xf32>, vector<1x64xf32> -> vector<1x64xf32>
    %c0_3 = arith.constant 0 : index
    %c0_4 = arith.constant 0 : index
    %3 = vector.load %arg3[%c0_3, %c0_4] : memref<1x64xf32, #tpu.memory_space<vmem>>, vector<1x64xf32>
    tpu.vector_store %arg3[%c0_3, %c0_4], %2 {strides = array<i32>} : memref<1x64xf32, #tpu.memory_space<vmem>>, vector<1x64xf32>,
    return
  }
  func.func @transform_0(%arg0: i32) -> (i32, i32) {
    %c0_i32 = arith.constant 0 : i32
    %c0_i32_0 = arith.constant 0 : i32
    return %arg0, %c0_i32 : i32, i32
  }
  func.func @transform_1(%arg0: i32) -> (i32, i32) {
    %c0_i32 = arith.constant 0 : i32
    %c0_i32_0 = arith.constant 0 : i32
    %c0_i32_1 = arith.constant 0 : i32
    return %c0_i32, %c0_i32_0 : i32, i32
  }
  func.func @transform_2(%arg0: i32) -> (i32, i32) {
    %c0_i32 = arith.constant 0 : i32
    %c0_i32_0 = arith.constant 0 : i32
    return %arg0, %c0_i32 : i32, i32
  }
}

</mosaic_0001>

<bundles_post_ra>
// kernel: tpu_custom_call.1
= control target key start
LH: loop header
LB: loop body
LE: loop exit
PB: predicated region body
PF: predicated region fallthrough
CT: control target
= control target key end

     0   :  { %v184_v47 = vlaneseq  ;;  %s1659_s0 = inlined_call_operand.vmem [shape: f32[1,1344], index: 0, kind: input, shape index: {}]   ;;  %s1660_s1 = inlined_call_operand.vmem [shape: f32[1344,64], index: 1, kind: input, shape index: {}]   ;;  %s1661_s2 = inlined_call_operand.hbm [shape: f32[1,64], index: 2, kind: output, shape index: {}]  }
   0x1   :  { %v30_v0 = vld [vmem:[%s1660_s1 + $0x80] sm:$0xff]  ;;  %v31_v1 = vld [vmem:[%s1660_s1 + $0x88] sm:$0xff]  ;;  %v32_v11 = vld [vmem:[%s1660_s1 + $0x90] sm:$0xff] }
   0x2   :  { %v62_v2 = vld [vmem:[%s1660_s1 + $0x180] sm:$0xff]  ;;  %v881_v3 = vpack.c.bf16 %v31_v1, %v30_v0  ;;  %v63_v4 = vld [vmem:[%s1660_s1 + $0x188] sm:$0xff]  ;;  %v33_v13 = vld [vmem:[%s1660_s1 + $0x98] sm:$0xff]  ;;  %v1226_v61 = vshrl.u32 %v184_v47, 7 }
   0x3   :  { %v14_v5 = vld [vmem:[%s1660_s1] sm:$0xff]  ;;  %v15_v6 = vld [vmem:[%s1660_s1 + $0x8] sm:$0xff]  ;;  %v913_v7 = vpack.c.bf16 %v63_v4, %v62_v2  ;;  %v64_v14 = vld [vmem:[%s1660_s1 + $0x190] sm:$0xff]  ;;  %v885_v16 = vpack.c.bf16 %v33_v13, %v32_v11 }
   0x4   :  { %v883_v8 = vpack.c.bf16 %v15_v6, %v14_v5  ;;  %v46_v9 = vld [vmem:[%s1660_s1 + $0x100] sm:$0xff]  ;;  %v47_v10 = vld [vmem:[%s1660_s1 + $0x108] sm:$0xff]  ;;  %882 = vmatprep.subr.bf16.mxu0 %v881_v3  ;;  %v65_v15 = vld [vmem:[%s1660_s1 + $0x198] sm:$0xff]  ;;  %v198_v11 = vsub.s32 3, %v1226_v61 }
   0x5   :  { %v915_v12 = vpack.c.bf16 %v47_v10, %v46_v9  ;;  %914 = vmatprep.subr.bf16.mxu1 %v913_v7  ;;  %v917_v17 = vpack.c.bf16 %v65_v15, %v64_v14  ;;  %v16_v18 = vld [vmem:[%s1660_s1 + $0x10] sm:$0xff]  ;;  %v17_v19 = vld [vmem:[%s1660_s1 + $0x18] sm:$0xff]  ;;  %v34_v23 = vld [vmem:[%s1660_s1 + $0xa0] sm:$0xff]  ;;  %v190_v10 = vsub.s32 1, %v1226_v61 }
   0x6   :  { %884 = vmatpush3.bf16.msra.mxu0 %v883_v8  ;;  %v48_v20 = vld [vmem:[%s1660_s1 + $0x110] sm:$0xff]  ;;  %v887_v21 = vpack.c.bf16 %v17_v19, %v16_v18  ;;  %v49_v22 = vld [vmem:[%s1660_s1 + $0x118] sm:$0xff]  ;;  %v35_v24 = vld [vmem:[%s1660_s1 + $0xa8] sm:$0xff] }
   0x7   :  { %916 = vmatpush3.bf16.msra.mxu1 %v915_v12  ;;  %886 = vmatprep.subr.bf16.mxu0 %v885_v16  ;;  %v919_v25 = vpack.c.bf16 %v49_v22, %v48_v20  ;;  %v889_v26 = vpack.c.bf16 %v35_v24, %v34_v23  ;;  %v66_v27 = vld [vmem:[%s1660_s1 + $0x1a0] sm:$0xff]  ;;  %v67_v28 = vld [vmem:[%s1660_s1 + $0x1a8] sm:$0xff]  ;;  %v36_v35 = vld [vmem:[%s1660_s1 + $0xb0] sm:$0xff] }
   0x8   :  { %918 = vmatprep.subr.bf16.mxu1 %v917_v17  ;;  %v18_v29 = vld [vmem:[%s1660_s1 + $0x20] sm:$0xff]  ;;  %v921_v30 = vpack.c.bf16 %v67_v28, %v66_v27  ;;  %v19_v31 = vld [vmem:[%s1660_s1 + $0x28] sm:$0xff]  ;;  %v37_v36 = vld [vmem:[%s1660_s1 + $0xb8] sm:$0xff] }
   0x9   :  { %v50_v32 = vld [vmem:[%s1660_s1 + $0x120] sm:$0xff]  ;;  %v51_v33 = vld [vmem:[%s1660_s1 + $0x128] sm:$0xff]  ;;  %v891_v34 = vpack.c.bf16 %v19_v31, %v18_v29  ;;  %v68_v37 = vld [vmem:[%s1660_s1 + $0x1b0] sm:$0xff]  ;;  %v893_v39 = vpack.c.bf16 %v37_v36, %v36_v35 }
   0xa   :  { %888 = vmatpush3.bf16.msra.mxu0 %v887_v21  ;;  %v923_v38 = vpack.c.bf16 %v51_v33, %v50_v32  ;;  %v69_v40 = vld [vmem:[%s1660_s1 + $0x1b8] sm:$0xff]  ;;  %v20_v41 = vld [vmem:[%s1660_s1 + $0x30] sm:$0xff]  ;;  %v38_v46 = vld [vmem:[%s1660_s1 + $0xc0] sm:$0xff] }
   0xb   :  { %920 = vmatpush3.bf16.msra.mxu1 %v919_v25  ;;  %890 = vmatprep.subr.bf16.mxu0 %v889_v26  ;;  %v21_v42 = vld [vmem:[%s1660_s1 + $0x38] sm:$0xff]  ;;  %v925_v43 = vpack.c.bf16 %v69_v40, %v68_v37  ;;  %v52_v44 = vld [vmem:[%s1660_s1 + $0x130] sm:$0xff]  ;;  %v39_v48 = vld [vmem:[%s1660_s1 + $0xc8] sm:$0xff] }
   0xc   :  { %922 = vmatprep.subr.bf16.mxu1 %v921_v30  ;;  %v53_v45 = vld [vmem:[%s1660_s1 + $0x138] sm:$0xff]  ;;  %v70_v49 = vld [vmem:[%s1660_s1 + $0x1c0] sm:$0xff]  ;;  %v71_v50 = vld [vmem:[%s1660_s1 + $0x1c8] sm:$0xff]  ;;  %v895_v51 = vpack.c.bf16 %v21_v42, %v20_v41  ;;  %v897_v53 = vpack.c.bf16 %v39_v48, %v38_v46 }
   0xd   :  { %v927_v52 = vpack.c.bf16 %v53_v45, %v52_v44  ;;  %v22_v54 = vld [vmem:[%s1660_s1 + $0x40] sm:$0xff]  ;;  %v23_v55 = vld [vmem:[%s1660_s1 + $0x48] sm:$0xff]  ;;  %v929_v57 = vpack.c.bf16 %v71_v50, %v70_v49  ;;  %v40_v59 = vld [vmem:[%s1660_s1 + $0xd0] sm:$0xff] }
   0xe   :  { %892 = vmatpush3.bf16.msra.mxu0 %v891_v34  ;;  %v54_v56 = vld [vmem:[%s1660_s1 + $0x140] sm:$0xff]  ;;  %v55_v58 = vld [vmem:[%s1660_s1 + $0x148] sm:$0xff]  ;;  %v41_v60 = vld [vmem:[%s1660_s1 + $0xd8] sm:$0xff]  ;;  %v899_v0 = vpack.c.bf16 %v23_v55, %v22_v54 }
   0xf   :  { %924 = vmatpush3.bf16.msra.mxu1 %v923_v38  ;;  %894 = vmatprep.subr.bf16.mxu0 %v893_v39  ;;  %v72_v62 = vld [vmem:[%s1660_s1 + $0x1d0] sm:$0xff]  ;;  %v73_v63 = vld [vmem:[%s1660_s1 + $0x1d8] sm:$0xff]  ;;  %v931_v1 = vpack.c.bf16 %v55_v58, %v54_v56  ;;  %v901_v2 = vpack.c.bf16 %v41_v60, %v40_v59  ;;  %v42_v8 = vld [vmem:[%s1660_s1 + $0xe0] sm:$0xff]  ;;  %v186_v39 = vsub.s32 0, %v1226_v61 }
  0x10   :  { %926 = vmatprep.subr.bf16.mxu1 %v925_v43  ;;  %v24_v3 = vld [vmem:[%s1660_s1 + $0x50] sm:$0xff]  ;;  %v25_v4 = vld [vmem:[%s1660_s1 + $0x58] sm:$0xff]  ;;  %v933_v6 = vpack.c.bf16 %v73_v63, %v72_v62  ;;  %v43_v9 = vld [vmem:[%s1660_s1 + $0xe8] sm:$0xff]  ;;  %v194_v43 = vsub.s32 2, %v1226_v61 }
  0x11   :  { %v56_v5 = vld [vmem:[%s1660_s1 + $0x150] sm:$0xff]  ;;  %v57_v7 = vld [vmem:[%s1660_s1 + $0x158] sm:$0xff]  ;;  %v74_v12 = vld [vmem:[%s1660_s1 + $0x1e0] sm:$0xff]  ;;  %v903_v14 = vpack.c.bf16 %v25_v4, %v24_v3  ;;  %v905_v17 = vpack.c.bf16 %v43_v9, %v42_v8 }
  0x12   :  { %896 = vmatpush3.bf16.msra.mxu0 %v895_v51  ;;  %v75_v13 = vld [vmem:[%s1660_s1 + $0x1e8] sm:$0xff]  ;;  %v26_v15 = vld [vmem:[%s1660_s1 + $0x60] sm:$0xff]  ;;  %v935_v16 = vpack.c.bf16 %v57_v7, %v56_v5  ;;  %v44_v23 = vld [vmem:[%s1660_s1 + $0xf0] sm:$0xff] }
  0x13   :  { %928 = vmatpush3.bf16.msra.mxu1 %v927_v52  ;;  %898 = vmatprep.subr.bf16.mxu0 %v897_v53  ;;  %v27_v18 = vld [vmem:[%s1660_s1 + $0x68] sm:$0xff]  ;;  %v58_v19 = vld [vmem:[%s1660_s1 + $0x160] sm:$0xff]  ;;  %v937_v21 = vpack.c.bf16 %v75_v13, %v74_v12  ;;  %v45_v24 = vld [vmem:[%s1660_s1 + $0xf8] sm:$0xff]  ;;  %v206_v53 = vsub.s32 5, %v1226_v61 }
  0x14   :  { %930 = vmatprep.subr.bf16.mxu1 %v929_v57  ;;  %v1272_v20 = vld [vmem:[%s1659_s0] sm:$0xff]  ;;  %v59_v22 = vld [vmem:[%s1660_s1 + $0x168] sm:$0xff]  ;;  %v76_v27 = vld [vmem:[%s1660_s1 + $0x1f0] sm:$0xff]  ;;  %v907_v29 = vpack.c.bf16 %v27_v18, %v26_v15  ;;  %v909_v31 = vpack.c.bf16 %v45_v24, %v44_v23  ;;  %v214_v57 = vsub.s32 7, %v1226_v61 }
  0x15   :  { %v191_v25 = vrot.slane %v1272_v20, %v190_v10  ;;  %v199_v26 = vrot.slane %v1272_v20, %v198_v11  ;;  %v77_v28 = vld [vmem:[%s1660_s1 + $0x1f8] sm:$0xff]  ;;  %v939_v30 = vpack.c.bf16 %v59_v22, %v58_v19  ;;  %v28_v32 = vld [vmem:[%s1660_s1 + $0x70] sm:$0xff]  ;;  %v94_v37 = vld [vmem:[%s1660_s1 + $0x280] sm:$0xff]  ;;  %v187_v54 = vrot.slane %v1272_v20, %v186_v39 }
  0x16   :  { %900 = vmatpush3.bf16.msra.mxu0 %v899_v0  ;;  %v29_v33 = vld [vmem:[%s1660_s1 + $0x78] sm:$0xff]  ;;  %v60_v34 = vld [vmem:[%s1660_s1 + $0x170] sm:$0xff]  ;;  %v941_v35 = vpack.c.bf16 %v77_v28, %v76_v27  ;;  %v95_v38 = vld [vmem:[%s1660_s1 + $0x288] sm:$0xff]  ;;  %v195_v58 = vrot.slane %v1272_v20, %v194_v43  ;;  %v215_v9 = vrot.slane %v1272_v20, %v214_v57 }
  0x17   :  { %932 = vmatpush3.bf16.msra.mxu1 %v931_v1  ;;  %902 = vmatprep.subr.bf16.mxu0 %v901_v2  ;;  %v61_v36 = vld [vmem:[%s1660_s1 + $0x178] sm:$0xff]  ;;  %v126_v40 = vld [vmem:[%s1660_s1 + $0x380] sm:$0xff]  ;;  %v127_v41 = vld [vmem:[%s1660_s1 + $0x388] sm:$0xff]  ;;  %v911_v42 = vpack.c.bf16 %v29_v33, %v28_v32  ;;  %v945_v45 = vpack.c.bf16 %v95_v38, %v94_v37 }
  0x18   :  { %934 = vmatprep.subr.bf16.mxu1 %v933_v6  ;;  %305 = vmatprep.mubr.f32.mxu0 %v191_v25  ;;  %v943_v44 = vpack.c.bf16 %v61_v36, %v60_v34  ;;  %v78_v46 = vld [vmem:[%s1660_s1 + $0x200] sm:$0xff]  ;;  %v79_v47 = vld [vmem:[%s1660_s1 + $0x208] sm:$0xff]  ;;  %v977_v49 = vpack.c.bf16 %v127_v41, %v126_v40  ;;  %v96_v51 = vld [vmem:[%s1660_s1 + $0x290] sm:$0xff]  ;;  %v207_v6 = vrot.slane %v1272_v20, %v206_v53 }
  0x19   :  { %375 = vmatprep.mubr.f32.mxu1 %v199_v26  ;;  %v110_v48 = vld [vmem:[%s1660_s1 + $0x300] sm:$0xff]  ;;  %v111_v50 = vld [vmem:[%s1660_s1 + $0x308] sm:$0xff]  ;;  %v97_v52 = vld [vmem:[%s1660_s1 + $0x298] sm:$0xff]  ;;  %v947_v59 = vpack.c.bf16 %v79_v47, %v78_v46 }
  0x1a   :  { %904 = vmatpush3.bf16.msra.mxu0 %v903_v14  ;;  %v128_v55 = vld [vmem:[%s1660_s1 + $0x390] sm:$0xff]  ;;  %v129_v56 = vld [vmem:[%s1660_s1 + $0x398] sm:$0xff]  ;;  %v979_v60 = vpack.c.bf16 %v111_v50, %v110_v48  ;;  %v949_v62 = vpack.c.bf16 %v97_v52, %v96_v51  ;;  %v98_v4 = vld [vmem:[%s1660_s1 + $0x2a0] sm:$0xff] }
  0x1b   :  { %936 = vmatpush3.bf16.msra.mxu1 %v935_v16  ;;  %906 = vmatprep.subr.bf16.mxu0 %v905_v17  ;;  %v80_v63 = vld [vmem:[%s1660_s1 + $0x210] sm:$0xff]  ;;  %v81_v0 = vld [vmem:[%s1660_s1 + $0x218] sm:$0xff]  ;;  %v981_v2 = vpack.c.bf16 %v129_v56, %v128_v55  ;;  %v99_v5 = vld [vmem:[%s1660_s1 + $0x2a8] sm:$0xff] }
  0x1c   :  { %938 = vmatprep.subr.bf16.mxu1 %v937_v21  ;;  %v112_v1 = vld [vmem:[%s1660_s1 + $0x310] sm:$0xff]  ;;  %v113_v3 = vld [vmem:[%s1660_s1 + $0x318] sm:$0xff]  ;;  %v130_v7 = vld [vmem:[%s1660_s1 + $0x3a0] sm:$0xff]  ;;  %v951_v11 = vpack.c.bf16 %v81_v0, %v80_v63  ;;  %v953_v13 = vpack.c.bf16 %v99_v5, %v98_v4 }
  0x1d   :  { %v131_v8 = vld [vmem:[%s1660_s1 + $0x3a8] sm:$0xff]  ;;  %v983_v12 = vpack.c.bf16 %v113_v3, %v112_v1  ;;  %v82_v14 = vld [vmem:[%s1660_s1 + $0x220] sm:$0xff]  ;;  %v100_v19 = vld [vmem:[%s1660_s1 + $0x2b0] sm:$0xff] }
  0x1e   :  { %908 = vmatpush3.bf16.msra.mxu0 %v907_v29  ;;  %v83_v15 = vld [vmem:[%s1660_s1 + $0x228] sm:$0xff]  ;;  %v114_v16 = vld [vmem:[%s1660_s1 + $0x320] sm:$0xff]  ;;  %v985_v17 = vpack.c.bf16 %v131_v8, %v130_v7  ;;  %v101_v21 = vld [vmem:[%s1660_s1 + $0x2b8] sm:$0xff] }
  0x1f   :  { %940 = vmatpush3.bf16.msra.mxu1 %v939_v30  ;;  %910 = vmatprep.subr.bf16.mxu0 %v909_v31  ;;  %v115_v18 = vld [vmem:[%s1660_s1 + $0x328] sm:$0xff]  ;;  %v132_v22 = vld [vmem:[%s1660_s1 + $0x3b0] sm:$0xff]  ;;  %v133_v23 = vld [vmem:[%s1660_s1 + $0x3b8] sm:$0xff]  ;;  %v955_v24 = vpack.c.bf16 %v83_v15, %v82_v14  ;;  %v957_v26 = vpack.c.bf16 %v101_v21, %v100_v19 }
  0x20   :  { %942 = vmatprep.subr.bf16.mxu1 %v941_v35  ;;  %v987_v25 = vpack.c.bf16 %v115_v18, %v114_v16  ;;  %v84_v27 = vld [vmem:[%s1660_s1 + $0x230] sm:$0xff]  ;;  %v85_v28 = vld [vmem:[%s1660_s1 + $0x238] sm:$0xff]  ;;  %v989_v30 = vpack.c.bf16 %v133_v23, %v132_v22  ;;  %v102_v32 = vld [vmem:[%s1660_s1 + $0x2c0] sm:$0xff] }
  0x21   :  { %v116_v29 = vld [vmem:[%s1660_s1 + $0x330] sm:$0xff]  ;;  %v117_v31 = vld [vmem:[%s1660_s1 + $0x338] sm:$0xff]  ;;  %v103_v33 = vld [vmem:[%s1660_s1 + $0x2c8] sm:$0xff]  ;;  %v959_v36 = vpack.c.bf16 %v85_v28, %v84_v27 }
  0x22   :  { %912 = vmatpush3.bf16.msra.mxu0 %v911_v42  ;;  %v134_v34 = vld [vmem:[%s1660_s1 + $0x3c0] sm:$0xff]  ;;  %v135_v35 = vld [vmem:[%s1660_s1 + $0x3c8] sm:$0xff]  ;;  %v991_v37 = vpack.c.bf16 %v117_v31, %v116_v29  ;;  %v961_v38 = vpack.c.bf16 %v103_v33, %v102_v32  ;;  %v104_v46 = vld [vmem:[%s1660_s1 + $0x2d0] sm:$0xff] }
  0x23   :  { %944 = vmatpush3.bf16.msra.mxu1 %v943_v44  ;;  %946 = vmatprep.subr.bf16.mxu0 %v945_v45  ;;  %v86_v40 = vld [vmem:[%s1660_s1 + $0x240] sm:$0xff]  ;;  %v87_v41 = vld [vmem:[%s1660_s1 + $0x248] sm:$0xff]  ;;  %v993_v44 = vpack.c.bf16 %v135_v35, %v134_v34  ;;  %v105_v47 = vld [vmem:[%s1660_s1 + $0x2d8] sm:$0xff] }
  0x24   :  { %978 = vmatprep.subr.bf16.mxu1 %v977_v49  ;;  %v118_v42 = vld [vmem:[%s1660_s1 + $0x340] sm:$0xff]  ;;  %v119_v45 = vld [vmem:[%s1660_s1 + $0x348] sm:$0xff]  ;;  %v136_v48 = vld [vmem:[%s1660_s1 + $0x3d0] sm:$0xff]  ;;  %v963_v50 = vpack.c.bf16 %v87_v41, %v86_v40  ;;  %v965_v52 = vpack.c.bf16 %v105_v47, %v104_v46 }
  0x25   :  { %306 = vmatmul.mubr.f32.vlgmr.msra.gmra.mrb[0].mxu0 %v187_v54  ;;  %v137_v49 = vld [vmem:[%s1660_s1 + $0x3d8] sm:$0xff]  ;;  %v995_v51 = vpack.c.bf16 %v119_v45, %v118_v42  ;;  %v88_v53 = vld [vmem:[%s1660_s1 + $0x250] sm:$0xff]  ;;  %v91_v3 = vld [vmem:[%s1660_s1 + $0x268] sm:$0xff] }
  0x26   :  { %376 = vmatmul.mubr.f32.vlgmr.msra.gmra.mrb[0].mxu1 %v195_v58  ;;  %948 = vmatpush3.bf16.msra.mxu0 %v947_v59  ;;  %v89_v54 = vld [vmem:[%s1660_s1 + $0x258] sm:$0xff]  ;;  %v120_v55 = vld [vmem:[%s1660_s1 + $0x350] sm:$0xff]  ;;  %v997_v56 = vpack.c.bf16 %v137_v49, %v136_v48  ;;  %v106_v58 = vld [vmem:[%s1660_s1 + $0x2e0] sm:$0xff] }
  0x27   :  { %980 = vmatpush3.bf16.msra.mxu1 %v979_v60  ;;  %950 = vmatprep.subr.bf16.mxu0 %v949_v62  ;;  %v121_v57 = vld [vmem:[%s1660_s1 + $0x358] sm:$0xff]  ;;  %v107_v59 = vld [vmem:[%s1660_s1 + $0x2e8] sm:$0xff]  ;;  %v138_v60 = vld [vmem:[%s1660_s1 + $0x3e0] sm:$0xff]  ;;  %v967_v63 = vpack.c.bf16 %v89_v54, %v88_v53 }
  0x28   :  { %982 = vmatprep.subr.bf16.mxu1 %v981_v2  ;;  %445 = vmatprep.mubr.f32.mxu0 %v207_v6  ;;  %v139_v62 = vld [vmem:[%s1660_s1 + $0x3e8] sm:$0xff]  ;;  %v999_v0 = vpack.c.bf16 %v121_v57, %v120_v55  ;;  %v969_v1 = vpack.c.bf16 %v107_v59, %v106_v58  ;;  %v90_v2 = vld [vmem:[%s1660_s1 + $0x260] sm:$0xff]  ;;  %v108_v7 = vld [vmem:[%s1660_s1 + $0x2f0] sm:$0xff] }
  0x29   :  { %515 = vmatprep.mubr.f32.mxu1 %v215_v9  ;;  %v122_v4 = vld [vmem:[%s1660_s1 + $0x360] sm:$0xff]  ;;  %v1001_v5 = vpack.c.bf16 %v139_v62, %v138_v60  ;;  %v123_v6 = vld [vmem:[%s1660_s1 + $0x368] sm:$0xff]  ;;  %v109_v8 = vld [vmem:[%s1660_s1 + $0x2f8] sm:$0xff] }
  0x2a   :  { %952 = vmatpush3.bf16.msra.mxu0 %v951_v11  ;;  %v140_v9 = vld [vmem:[%s1660_s1 + $0x3f0] sm:$0xff]  ;;  %v141_v11 = vld [vmem:[%s1660_s1 + $0x3f8] sm:$0xff] }
  0x2b   :  { %984 = vmatpush3.bf16.msra.mxu1 %v983_v12  ;;  %954 = vmatprep.subr.bf16.mxu0 %v953_v13  ;;  %v971_v12 = vpack.c.bf16 %v91_v3, %v90_v2 }
  0x2c   :  { %986 = vmatprep.subr.bf16.mxu1 %v985_v17 }
  0x2e   :  { %956 = vmatpush3.bf16.msra.mxu0 %v955_v24 }
  0x2f   :  { %988 = vmatpush3.bf16.msra.mxu1 %v987_v25  ;;  %958 = vmatprep.subr.bf16.mxu0 %v957_v26 }
  0x30   :  { %990 = vmatprep.subr.bf16.mxu1 %v989_v30 }
  0x32   :  { %960 = vmatpush3.bf16.msra.mxu0 %v959_v36 }
  0x33   :  { %992 = vmatpush3.bf16.msra.mxu1 %v991_v37  ;;  %962 = vmatprep.subr.bf16.mxu0 %v961_v38 }
  0x34   :  { %994 = vmatprep.subr.bf16.mxu1 %v993_v44 }
  0x36   :  { %964 = vmatpush3.bf16.msra.mxu0 %v963_v50 }
  0x37   :  { %996 = vmatpush3.bf16.msra.mxu1 %v995_v51  ;;  %966 = vmatprep.subr.bf16.mxu0 %v965_v52 }
  0x38   :  { %998 = vmatprep.subr.bf16.mxu1 %v997_v56 }
  0x3a   :  { %968 = vmatpush3.bf16.msra.mxu0 %v967_v63 }
  0x3b   :  { %7 = vsyncpa [#allocation3], 0  ;;  %1000 = vmatpush3.bf16.msra.mxu1 %v999_v0  ;;  %970 = vmatprep.subr.bf16.mxu0 %v969_v1  ;;  %v1003_v13 = vpack.c.bf16 %v123_v6, %v122_v4  ;;  %v973_v14 = vpack.c.bf16 %v109_v8, %v108_v7  ;;  %v92_v15 = vld [vmem:[%s1660_s1 + $0x270] sm:$0xff]  ;;  %v93_v16 = vld [vmem:[%s1660_s1 + $0x278] sm:$0xff]  ;;  %v1005_v18 = vpack.c.bf16 %v141_v11, %v140_v9  ;;  %v202_v23 = vsub.s32 4, %v1226_v61 }
  0x3c   :  { %v124_v17 = vld [vmem:[%s1660_s1 + $0x370] sm:$0xff]  ;;  %1002 = vmatprep.subr.bf16.mxu1 %v1001_v5  ;;  %v125_v19 = vld [vmem:[%s1660_s1 + $0x378] sm:$0xff]  ;;  %v158_v21 = vld [vmem:[%s1660_s1 + $0x480] sm:$0xff]  ;;  %v975_v24 = vpack.c.bf16 %v93_v16, %v92_v15  ;;  %v210_v25 = vsub.s32 6, %v1226_v61  ;;  %v1081_v45 = vmov 0.0|0.0   ;;  %vm1082_vm0 = vmmov 0  }
  0x3d   :  { %v159_v22 = vld [vmem:[%s1660_s1 + $0x488] sm:$0xff]  ;;  %v1007_v26 = vpack.c.bf16 %v125_v19, %v124_v17  ;;  %v142_v28 = vld [vmem:[%s1660_s1 + $0x400] sm:$0xff]  ;;  %v160_v30 = vld [vmem:[%s1660_s1 + $0x490] sm:$0xff]  ;;  %v203_v34 = vrot.slane %v1272_v20, %v202_v23  ;;  %v1083_v57 = vmov 0.0   ;;  %vm238_vm1 = vcmask 523264  }
  0x3e   :  { %972 = vmatpush3.bf16.msra.mxu0 %v971_v12  ;;  %v1009_v27 = vpack.c.bf16 %v159_v22, %v158_v21  ;;  %v143_v29 = vld [vmem:[%s1660_s1 + $0x408] sm:$0xff]  ;;  %v161_v31 = vld [vmem:[%s1660_s1 + $0x498] sm:$0xff]  ;;  %v174_v32 = vld [vmem:[%s1660_s1 + $0x500] sm:$0xff]  ;;  %v211_v37 = vrot.slane %v1272_v20, %v210_v25  ;;  %vm661_vm2 = vcmask 516096  }
  0x3f   :  { %1004 = vmatpush3.bf16.msra.mxu1 %v1003_v13  ;;  %974 = vmatprep.subr.bf16.mxu0 %v973_v14  ;;  %v175_v33 = vld [vmem:[%s1660_s1 + $0x508] sm:$0xff]  ;;  %v1011_v36 = vpack.c.bf16 %v143_v29, %v142_v28  ;;  %v1013_v38 = vpack.c.bf16 %v161_v31, %v160_v30  ;;  %v144_v40 = vld [vmem:[%s1660_s1 + $0x410] sm:$0xff]  ;;  %v145_v41 = vld [vmem:[%s1660_s1 + $0x418] sm:$0xff] }
  0x40   :  { %1006 = vmatprep.subr.bf16.mxu1 %v1005_v18  ;;  %v1539_v35 = vld [vmem:[%s1659_s0 + $0x8] sm:$0x7]  ;;  %v162_v42 = vld [vmem:[%s1660_s1 + $0x4a0] sm:$0xff]  ;;  %v1042_v44 = vpack.c.bf16 %v175_v33, %v174_v32  ;;  %v176_v46 = vld [vmem:[%s1660_s1 + $0x510] sm:$0xff]  ;;  %v1015_v49 = vpack.c.bf16 %v145_v41, %v144_v40 }
  0x41   :  { %v163_v20 = vld [vmem:[%s1660_s1 + $0x4a8] sm:$0xff]  ;;  %v177_v47 = vld [vmem:[%s1660_s1 + $0x518] sm:$0xff]  ;;  %v223_v48 = vrot.slane %v1539_v35, %v190_v10  ;;  %v146_v51 = vld [vmem:[%s1660_s1 + $0x420] sm:$0xff]  ;;  %v227_v13 = vrot.slane %v1539_v35, %v194_v43  ;;  %v219_v30 = vrot.slane %v1539_v35, %v186_v39 }
  0x42   :  { %976 = vmatpush3.bf16.msra.mxu0 %v975_v24  ;;  %v1017_v50 = vpack.c.bf16 %v163_v20, %v162_v42  ;;  %v147_v52 = vld [vmem:[%s1660_s1 + $0x428] sm:$0xff]  ;;  %v164_v53 = vld [vmem:[%s1660_s1 + $0x4b0] sm:$0xff]  ;;  %v1045_v10 = vpack.c.bf16 %v177_v47, %v176_v46  ;;  %v165_v54 = vld [vmem:[%s1660_s1 + $0x4b8] sm:$0xff] }
  0x43   :  { %1008 = vmatpush3.bf16.msra.mxu1 %v1007_v26  ;;  %1010 = vmatprep.subr.bf16.mxu0 %v1009_v27  ;;  %v178_v55 = vld [vmem:[%s1660_s1 + $0x520] sm:$0xff]  ;;  %v179_v56 = vld [vmem:[%s1660_s1 + $0x528] sm:$0xff]  ;;  %v1019_v58 = vpack.c.bf16 %v147_v52, %v146_v51  ;;  %v1021_v59 = vpack.c.bf16 %v165_v54, %v164_v53  ;;  %v148_v60 = vld [vmem:[%s1660_s1 + $0x430] sm:$0xff] }
  0x44   :  { %1041 = vmatprep.subr.bf16.mxu1 %v1081_v45  ;;  %v149_v62 = vld [vmem:[%s1660_s1 + $0x438] sm:$0xff]  ;;  %v166_v63 = vld [vmem:[%s1660_s1 + $0x4c0] sm:$0xff]  ;;  %v1048_v0 = vpack.c.bf16 %v179_v56, %v178_v55  ;;  %v167_v1 = vld [vmem:[%s1660_s1 + $0x4c8] sm:$0xff] }
  0x45   :  { %446 = vmatmul.mubr.f32.vlgmr.msra.gmra.mrb[2].mxu0 %v203_v34  ;;  %v180_v2 = vld [vmem:[%s1660_s1 + $0x530] sm:$0xff]  ;;  %v181_v3 = vld [vmem:[%s1660_s1 + $0x538] sm:$0xff]  ;;  %v1023_v4 = vpack.c.bf16 %v149_v62, %v148_v60  ;;  %v1025_v5 = vpack.c.bf16 %v167_v1, %v166_v63  ;;  %v150_v6 = vld [vmem:[%s1660_s1 + $0x440] sm:$0xff] }
  0x46   :  { %1012 = vmatpush3.bf16.msra.mxu0 %v1011_v36  ;;  %516 = vmatmul.mubr.f32.vlgmr.msra.gmra.mrb[2].mxu1 %v211_v37  ;;  %v151_v7 = vld [vmem:[%s1660_s1 + $0x448] sm:$0xff]  ;;  %v1051_v8 = vpack.c.bf16 %v181_v3, %v180_v2  ;;  %v168_v9 = vld [vmem:[%s1660_s1 + $0x4d0] sm:$0xff]  ;;  %v169_v11 = vld [vmem:[%s1660_s1 + $0x4d8] sm:$0xff] }
  0x47   :  { %1014 = vmatprep.subr.bf16.mxu0 %v1013_v38  ;;  %1043 = vmatpush3.bf16.msra.mxu1 %v1042_v44  ;;  %v1027_v12 = vpack.c.bf16 %v151_v7, %v150_v6  ;;  %v1029_v14 = vpack.c.bf16 %v169_v11, %v168_v9  ;;  %v152_v15 = vld [vmem:[%s1660_s1 + $0x450] sm:$0xff]  ;;  %v153_v16 = vld [vmem:[%s1660_s1 + $0x458] sm:$0xff]  ;;  %v170_v17 = vld [vmem:[%s1660_s1 + $0x4e0] sm:$0xff] }
  0x48   :  { %1044 = vmatprep.subr.bf16.mxu1 %v1081_v45  ;;  %585 = vmatprep.mubr.f32.mxu0 %v223_v48  ;;  %v171_v43 = vld [vmem:[%s1660_s1 + $0x4e8] sm:$0xff]  ;;  %v1031_v18 = vpack.c.bf16 %v153_v16, %v152_v15  ;;  %v154_v21 = vld [vmem:[%s1660_s1 + $0x460] sm:$0xff]  ;;  %v172_v23 = vld [vmem:[%s1660_s1 + $0x4f0] sm:$0xff] }
  0x49   :  { %878 = vmatprep.mubr.msk.f32.mxu1 %vm1082_vm0, %v1083_v57  ;;  %v1033_v19 = vpack.c.bf16 %v171_v43, %v170_v17  ;;  %v155_v22 = vld [vmem:[%s1660_s1 + $0x468] sm:$0xff]  ;;  %v173_v24 = vld [vmem:[%s1660_s1 + $0x4f8] sm:$0xff]  ;;  %v156_v27 = vld [vmem:[%s1660_s1 + $0x470] sm:$0xff] }
  0x4a   :  { %1016 = vmatpush3.bf16.msra.mxu0 %v1015_v49  ;;  %v1035_v25 = vpack.c.bf16 %v155_v22, %v154_v21  ;;  %v1037_v26 = vpack.c.bf16 %v173_v24, %v172_v23  ;;  %v157_v28 = vld [vmem:[%s1660_s1 + $0x478] sm:$0xff]  ;;  %s1084_s1 = smov [#allocation2]  }
  0x4b   :  { %1018 = vmatprep.subr.bf16.mxu0 %v1017_v50  ;;  %1046 = vmatpush3.bf16.msra.mxu1 %v1045_v10  ;;  %v1039_v29 = vpack.c.bf16 %v157_v28, %v156_v27  ;;  %s669_s0 = sshll.u32 %s1084_s1, 4  ;;  %s670_s0 = int_to_ptr.vmem [resolvable:$true] %s669_s0 }
  0x4c   :  { %1047 = vmatprep.subr.bf16.mxu1 %v1081_v45  ;;  %s1057_s11 = scalar_lea.vmem %s670_s0, 16  ;;  %s1061_s12 = scalar_lea.vmem %s670_s0, 32 }
  0x4d   :  { %p1058_p0 = scmp.ne.s32.totalorder %s670_s0, %s1057_s11  ;;  %p1062_p1 = scmp.lt.s32.totalorder %s670_s0, %s670_s0 }
  0x4e   :  { %1020 = vmatpush3.bf16.msra.mxu0 %v1019_v58  ;;  %p1063_p2 = scmp.lt.s32.totalorder %s1061_s12, %s1057_s11 }
  0x4f   :  { %1022 = vmatprep.subr.bf16.mxu0 %v1021_v59  ;;  %1049 = vmatpush3.bf16.msra.mxu1 %v1048_v0 }
  0x50   :  { %1050 = vmatprep.subr.bf16.mxu1 %v1081_v45  ;;  %p1064_p3 = por %p1063_p2, %p1062_p1 }
  0x52   :  { %1024 = vmatpush3.bf16.msra.mxu0 %v1023_v4  ;;  %p1065_p4 = pnand %p1064_p3, %p1058_p0 }
  0x53   :  { %1026 = vmatprep.subr.bf16.mxu0 %v1025_v5  ;;  %1052 = vmatpush3.bf16.msra.mxu1 %v1051_v8 }
  0x56   :  { %1028 = vmatpush3.bf16.msra.mxu0 %v1027_v12  ;;  %879 = vmatmul.mubr.msk.f32.vlgmr.msra.gmra.mrb[4].mxu1 %vm238_vm1, %v227_v13 }
  0x57   :  { %1030 = vmatprep.subr.bf16.mxu0 %v1029_v14 }
  0x5a   :  { %1032 = vmatpush3.bf16.msra.mxu0 %v1031_v18 }
  0x5b   :  { %1034 = vmatprep.subr.bf16.mxu0 %v1033_v19 }
  0x5e   :  { %1036 = vmatpush3.bf16.msra.mxu0 %v1035_v25 }
  0x5f   :  { %1038 = vmatprep.subr.bf16.mxu0 %v1037_v26 }
  0x62   :  { %1040 = vmatpush3.bf16.msra.mxu0 %v1039_v29 }
  0x65   :  { %586 = vmatmul.mubr.f32.vlgmr.msra.gmra.mrb[4].mxu0 %v219_v30 }
  0xf8   :  { %v710_v31 = vpop.f32.mrb[0].mxu0 }
  0xf9   :  { %v745_v32 = vpop.f32.mrb[0].mxu1  ;;  %v711_v33 = vpop.f32.mrb[1].mxu0 }
  0xfa   :  { %v712_v34 = vadd.f32 %v711_v33, %v710_v31  ;;  %v746_v36 = vpop.f32.mrb[1].mxu1 }
  0xfb   :  { %v747_v37 = vadd.f32 %v746_v36, %v745_v32 }
  0xfd   :  { %v378_v38 = vadd.f32 %v747_v37, %v712_v34 }
 0x118   :  { %v780_v40 = vpop.f32.mrb[2].mxu0 }
 0x119   :  { %v781_v41 = vpop.f32.mrb[3].mxu0  ;;  %v815_v42 = vpop.f32.mrb[2].mxu1 }
 0x11a   :  { %v782_v44 = vadd.f32 %v781_v41, %v780_v40  ;;  %v816_v20 = vpop.f32.mrb[3].mxu1 }
 0x11b   :  { %v817_v45 = vadd.f32 %v816_v20, %v815_v42 }
 0x11c   :  { %v448_v46 = vadd.f32 %v782_v44, %v378_v38 }
 0x11e   :  { %v518_v47 = vadd.f32 %v817_v45, %v448_v46 }
 0x129   :  { %v657_v61 = vpop.f32.mrb[4].mxu1 }
 0x12a   :  { %v880_v48 = vpop.f32.mrb[5].mxu1 }
 0x138   :  { %v850_v39 = vpop.f32.mrb[4].mxu0 }
 0x139   :  { %v851_v35 = vpop.f32.mrb[5].mxu0 }
 0x13a   :  { %v852_v49 = vadd.f32 %v851_v35, %v850_v39 }
 0x13c   :  { %v588_v50 = vadd.f32 %v852_v49, %v518_v47 }
 0x13e   :  { %v658_v51 = vadd.f32 %v657_v61, %v588_v50 }
 0x140   :  { %662 = vst.msk [vmem:[#allocation2] sm:$0x1] %vm661_vm2, %v658_v51 }
 0x141   :  { %1068 = shalt.err (!%p1065_p4)
}
 0x142   :  { %s1069_s15 = scalar_lea.hbm %s1661_s2, 16 }
 0x143   :  { %p1070_p5 = scmp.ne.s32.totalorder %s1661_s2, %s1069_s15  ;;  %p1073_p6 = scmp.lt.u32.totalorder %s1069_s15, %s1661_s2 }
 0x145   :  { %p1075_p7 = pnand %p1073_p6, %p1070_p5 }
 0x147   :  { %1078 = shalt.err (!%p1075_p7)
}
 0x148   :  { %672 = dma.vmem_to_hbm [thread:$0]  %s670_s0, 16, %s1661_s2, [#allocation3]  }
 0x149   :  { %1079 = dma.done.wait [#allocation3], 16  }
 0x14a   :  { %1080 = vsyncadd [#allocation3], 4294967280 }
 0x14b   :  { %676 = vsyncpa [#allocation3], 1 }

</bundles_post_ra>
